<compile_context>
chip_gen: v6e
topology: v6e:2x2x1
jax: 0.10.0
libtpu: 0.0.40
codegen_flags: <defaults>
</compile_context>

<pallas_src>
import functools

import jax
import jax.numpy as jnp
from jax import lax
from jax.experimental import pallas as pl
from jax.experimental.pallas import tpu as pltpu

EPS = 1e-5  # nn.BatchNorm2d default eps
_MIB = 1024 * 1024


# ---------------------------------------------------------------------------
# Generation-aware budgets (v5e/v6e: 128 MiB VMEM; v7x: 64 MiB per TC).
# ---------------------------------------------------------------------------
def _generation_budgets():
    cap = 64 * _MIB
    try:
        info = pltpu.get_tpu_info()
        cap = int(getattr(info, "vmem_capacity_bytes", cap))
    except Exception:
        pass
    if cap >= 100 * _MIB:          # v5e / v6e (128 MiB VMEM)
        return dict(block_target=8 * _MIB, vmem_ceiling=96 * _MIB,
                    fused_cutoff=12 * _MIB)
    else:                           # v7x (64 MiB VMEM, 32 MiB default scoped)
        return dict(block_target=4 * _MIB, vmem_ceiling=48 * _MIB,
                    fused_cutoff=6 * _MIB)


# ---------------------------------------------------------------------------
# Single-pass fused kernel (whole tensor resident in VMEM).
# ---------------------------------------------------------------------------
def _bn_fused_kernel(x_ref, w_ref, b_ref, o_ref, *, inv_m):
    x = x_ref[...].astype(jnp.float32)                        # (N, C, HW)
    s = jnp.sum(x, axis=2, keepdims=True)                     # (N, C, 1)
    ss = jnp.sum(x * x, axis=2, keepdims=True)                 # (N, C, 1)
    mean = jnp.sum(s, axis=0, keepdims=True) * inv_m           # (1, C, 1)
    meansqr = jnp.sum(ss, axis=0, keepdims=True) * inv_m       # (1, C, 1)
    var = jnp.maximum(meansqr - mean * mean, 0.0)               # biased, clamped
    invstd = lax.rsqrt(var + EPS)
    scale = w_ref[...].astype(jnp.float32) * invstd             # (1, C, 1)
    shift = b_ref[...].astype(jnp.float32) - mean * scale       # (1, C, 1)
    o_ref[...] = (x * scale + shift).astype(o_ref.dtype)


# ---------------------------------------------------------------------------
# Pass 1: per-n-chunk partial sum / sum-of-squares.
#   Lane-wide VMEM scratch accumulators (pure VPU adds in the hot loop); the
#   cross-lane reduce + width-1 output store happen once per n-chunk (finalize).
#   Outputs indexed by the n-chunk -> N grid axis can be "parallel" (megacore).
# ---------------------------------------------------------------------------
def _bn_stats_kernel(x_ref, psum_ref, pssq_ref, sum_acc, ssq_acc, *,
                     hw, hw_tile, acc_width, mask_last):
    h_i = pl.program_id(1)
    last_h = pl.num_programs(1) - 1

    @pl.when(h_i == 0)
    def _init():
        sum_acc[...] = jnp.zeros_like(sum_acc)
        ssq_acc[...] = jnp.zeros_like(ssq_acc)

    def _accum(xf):
        s2 = jnp.sum(xf, axis=0)                       # (C, hw_tile)   VPU
        q2 = jnp.sum(xf * xf, axis=0)                  # (C, hw_tile)   VPU
        if acc_width == 128:
            # Fold lanes into a resident 128-wide accumulator with static,
            # vreg-aligned 128-lane slices (VPU adds, no XLU in the hot loop).
            ps = s2[:, 0:128]
            pq = q2[:, 0:128]
            for j in range(1, hw_tile // 128):
                lo = j * 128
                ps = ps + s2[:, lo:lo + 128]
                pq = pq + q2[:, lo:lo + 128]
        else:
            # hw_tile not a multiple of 128 only happens when hw_grid == 1,
            # so this XLU reduce runs once per n-chunk (negligible).
            ps = jnp.sum(s2, axis=-1, keepdims=True)   # (C, 1)
            pq = jnp.sum(q2, axis=-1, keepdims=True)
        sum_acc[...] += ps[None]
        ssq_acc[...] += pq[None]

    xf = x_ref[...].astype(jnp.float32)                # (n_tile, C, hw_tile)
    if mask_last:
        # Mask only the partial last HW tile; full tiles pay no mask cost.
        @pl.when(h_i < last_h)
        def _full():
            _accum(xf)

        @pl.when(h_i == last_h)
        def _partial():
            lane = lax.broadcasted_iota(jnp.int32, xf.shape, 2) + h_i * hw_tile
            _accum(jnp.where(lane < hw, xf, 0.0))
    else:
        _accum(xf)

    @pl.when(h_i == last_h)
    def _finalize():
        psum_ref[...] = jnp.sum(sum_acc[...], axis=2, keepdims=True)
        pssq_ref[...] = jnp.sum(ssq_acc[...], axis=2, keepdims=True)


# ---------------------------------------------------------------------------
# Pass 2: stream tiles again and apply the per-channel affine.
# ---------------------------------------------------------------------------
def _bn_apply_kernel(x_ref, scale_ref, shift_ref, o_ref):
    x = x_ref[...].astype(jnp.float32)
    o_ref[...] = (x * scale_ref[...] + shift_ref[...]).astype(o_ref.dtype)


# ---------------------------------------------------------------------------
# Tile selection: (n_tile, C, hw_tile) sized toward block_target bytes.
#   - prefer full HW (fully contiguous block) when it fits,
#   - otherwise a large multiple-of-128 lane tile; accept an exact divisor only
#     if it is >= max(1024, max_lanes // 2), else use max_lanes with a masked
#     partial last tile,
#   - then grow n_tile over divisors of N up to the block target.
# ---------------------------------------------------------------------------
def _pick_tiles(N, C, HW, itemsize, block_target):
    row_bytes = max(1, C * itemsize)
    if C * HW * itemsize <= block_target or HW <= 128:
        hw_tile = HW
    else:
        max_lanes = (block_target // row_bytes) // 128 * 128
        max_lanes = int(max(128, min(max_lanes, (HW // 128) * 128)))
        hw_tile = max_lanes
        floor = max(1024, max_lanes // 2)
        for t in range(max_lanes, floor - 1, -128):
            if HW % t == 0:
                hw_tile = t
                break
    n_tile = 1
    for d in range(N, 0, -1):
        if N % d == 0 and d * C * hw_tile * itemsize <= block_target:
            n_tile = d
            break
    return n_tile, hw_tile


def dynamic_batch_norm_2d(x, weight, bias, *, force_two_pass=False,
                          block_target_bytes=None):
    """Forward of DynamicBatchNorm2d (training, need_sync=False path).

    x: (N, C, H, W). weight/bias: (max_feature_dim,) shared BN affine params.
    Batch-statistics BN using weight[:C], bias[:C] (biased variance).
    """
    N, C, H, W = x.shape
    HW = H * W
    inv_m = 1.0 / float(N * HW)
    itemsize = jnp.dtype(x.dtype).itemsize
    budgets = _generation_budgets()
    block_target = int(block_target_bytes or budgets["block_target"])
    ceiling = budgets["vmem_ceiling"]

    # Free reshapes only (no HBM transpose traffic).
    x3 = x.reshape(N, C, HW)
    wf = weight[:C].astype(jnp.float32)
    bf = bias[:C].astype(jnp.float32)

    data_bytes = N * C * HW * itemsize
    data_f32 = N * C * HW * 4
    fused_need = 2 * data_bytes + 3 * data_f32 + 2 * _MIB

    if (not force_two_pass and data_bytes <= budgets["fused_cutoff"]
            and fused_need <= ceiling):
        # Small-tensor fast path: one HBM read + one HBM write.
        out3 = pl.pallas_call(
            functools.partial(_bn_fused_kernel, inv_m=inv_m),
            out_shape=jax.ShapeDtypeStruct((N, C, HW), x.dtype),
            grid=(1,),
            in_specs=[
                pl.BlockSpec((N, C, HW), lambda i: (0, 0, 0)),
                pl.BlockSpec((1, C, 1), lambda i: (0, 0, 0)),
                pl.BlockSpec((1, C, 1), lambda i: (0, 0, 0)),
            ],
            out_specs=pl.BlockSpec((N, C, HW), lambda i: (0, 0, 0)),
            compiler_params=pltpu.CompilerParams(
                dimension_semantics=("arbitrary",),
                vmem_limit_bytes=int(max(16 * _MIB, fused_need)),
            ),
        )(x3, wf.reshape(1, C, 1), bf.reshape(1, C, 1))
        return out3.reshape(N, C, H, W)

    n_tile, hw_tile = _pick_tiles(N, C, HW, itemsize, block_target)
    n_grid = N // n_tile
    hw_grid = pl.cdiv(HW, hw_tile)
    mask_last = (HW % hw_tile) != 0
    acc_width = 128 if hw_tile % 128 == 0 else 1

    tile_bytes = n_tile * C * hw_tile * itemsize
    tile_f32 = n_tile * C * hw_tile * 4
    scratch_bytes = 2 * C * acc_width * 4
    stats_vmem = int(min(ceiling, max(16 * _MIB,
                                      2 * tile_bytes + 3 * tile_f32
                                      + scratch_bytes + 4 * _MIB)))
    apply_vmem = int(min(ceiling, max(16 * _MIB,
                                      4 * tile_bytes + 2 * tile_f32 + 4 * _MIB)))

    x_spec = pl.BlockSpec((n_tile, C, hw_tile), lambda n, h: (n, 0, h))
    part_spec = pl.BlockSpec((1, C, 1), lambda n, h: (n, 0, 0))
    vec_spec = pl.BlockSpec((1, C, 1), lambda n, h: (0, 0, 0))

    # Pass 1: per-n-chunk partial sums; N axis "parallel" (megacore-shardable),
    # HW axis "arbitrary" (sequential reduction over the resident scratch).
    psum, pssq = pl.pallas_call(
        functools.partial(_bn_stats_kernel, hw=HW, hw_tile=hw_tile,
                          acc_width=acc_width, mask_last=mask_last),
        out_shape=(jax.ShapeDtypeStruct((n_grid, C, 1), jnp.float32),
                   jax.ShapeDtypeStruct((n_grid, C, 1), jnp.float32)),
        grid=(n_grid, hw_grid),
        in_specs=[x_spec],
        out_specs=(part_spec, part_spec),
        scratch_shapes=[pltpu.VMEM((1, C, acc_width), jnp.float32),
                        pltpu.VMEM((1, C, acc_width), jnp.float32)],
        compiler_params=pltpu.CompilerParams(
            dimension_semantics=("parallel", "arbitrary"),
            vmem_limit_bytes=stats_vmem,
        ),
    )(x3)

    # Tiny JAX epilogue: reduce partials, form per-channel scale/shift.
    mean = jnp.sum(psum[:, :, 0], axis=0) * inv_m          # (C,)
    meansqr = jnp.sum(pssq[:, :, 0], axis=0) * inv_m       # (C,)
    var = jnp.maximum(meansqr - mean * mean, 0.0)           # biased, clamped
    invstd = lax.rsqrt(var + EPS)
    scale = (wf * invstd).reshape(1, C, 1)
    shift = (bf - mean * wf * invstd).reshape(1, C, 1)

    # Pass 2: normalize; fully parallel grid, lane-dense output tiles.
    # (Partial last HW block reads/writes OOB lanes; Pallas discards them.)
    out3 = pl.pallas_call(
        _bn_apply_kernel,
        out_shape=jax.ShapeDtypeStruct((N, C, HW), x.dtype),
        grid=(n_grid, hw_grid),
        in_specs=[x_spec, vec_spec, vec_spec],
        out_specs=x_spec,
        compiler_params=pltpu.CompilerParams(
            dimension_semantics=("parallel", "parallel"),
            vmem_limit_bytes=apply_vmem,
        ),
    )(x3, scale, shift)

    return out3.reshape(N, C, H, W)


def _reference(x, weight, bias):
    # Pure-JAX reference of F.batch_norm in training mode (biased variance).
    C = x.shape[1]
    xf = x.astype(jnp.float32)
    mean = jnp.mean(xf, axis=(0, 2, 3))
    var = jnp.mean(xf * xf, axis=(0, 2, 3)) - mean * mean
    invstd = 1.0 / jnp.sqrt(var + EPS)
    scale = (weight[:C] * invstd).reshape(1, C, 1, 1)
    shift = (bias[:C] - mean * weight[:C] * invstd).reshape(1, C, 1, 1)
    return (xf * scale + shift).astype(x.dtype)


if __name__ == "__main__":
    key = jax.random.PRNGKey(0)
    k_x, k_w, k_b, k_x2 = jax.random.split(key, 4)

    max_feature_dim = 8           # DynamicBatchNorm2d(max_feature_dim)
    N, C, H, W = 2, 4, 16, 16     # active feature_dim = 4 (< max_feature_dim)

    x = jax.random.normal(k_x, (N, C, H, W), dtype=jnp.float32)
    weight = 1.0 + 0.1 * jax.random.normal(k_w, (max_feature_dim,), dtype=jnp.float32)
    bias = 0.1 * jax.random.normal(k_b, (max_feature_dim,), dtype=jnp.float32)

    ref = _reference(x, weight, bias)

    # Small-tensor fused path and the tiled two-pass path.
    out_fast = jax.block_until_ready(dynamic_batch_norm_2d(x, weight, bias))
    out_tiled = jax.block_until_ready(
        dynamic_batch_norm_2d(x, weight, bias, force_two_pass=True))
    assert out_fast.shape == (N, C, H, W)
    assert out_tiled.shape == (N, C, H, W)
    assert jnp.allclose(out_fast, ref, atol=1e-4, rtol=1e-4)
    assert jnp.allclose(out_tiled, ref, atol=1e-4, rtol=1e-4)

    # Exercise multi-tile HW, the masked partial last tile, and the per-n-chunk
    # partial-sum path by forcing a tiny block budget (HW=324 not a multiple
    # of 128).
    x2 = jax.random.normal(k_x2, (2, 8, 18, 18), dtype=jnp.float32)
    ref2 = _reference(x2, weight, bias)
    out_masked = jax.block_until_ready(
        dynamic_batch_norm_2d(x2, weight, bias, force_two_pass=True,
                              block_target_bytes=4096))
    assert out_masked.shape == x2.shape
    assert jnp.allclose(out_masked, ref2, atol=1e-4, rtol=1e-4)

    # TODO(synk): need_sync=True branch uses torch.distributed all-gather/all-reduce
    # (AllReduce.apply); this single-device kernel implements the need_sync=False path only.
    # TODO(synk): running_mean/running_var (momentum) side-effect updates of training-mode
    # BatchNorm and the bn_tracking modules are not produced; only the normalize output is.
    print("KERNEL_OK")
</pallas_src>

<mosaic_0001>
module attributes {stable_mosaic.version = 11 : i64} {
  func.func @_bn_fused_kernel(%arg0: i32, %arg1: memref<2x4x256xf32, #tpu.memory_space<vmem>>, %arg2: memref<1x4x1xf32, #tpu.memory_space<vmem>>, %arg3: memref<1x4x1xf32, #tpu.memory_space<vmem>>, %arg4: memref<2x4x256xf32, #tpu.memory_space<vmem>>) attributes {dimension_semantics = [#tpu.dimension_semantics<arbitrary>], iteration_bounds = array<i64: 1>, scalar_prefetch = 0 : i64, scratch_operands = 0 : i64, tpu.core_type = #tpu.core_type<tc>, window_params = [{pipeline_mode = #tpu.pipeline_mode<synchronous>, transform_indices = @transform_0, window_bounds = array<i64: 2, 4, 256>}, {pipeline_mode = #tpu.pipeline_mode<synchronous>, transform_indices = @transform_1, window_bounds = array<i64: 1, 4, 1>}, {pipeline_mode = #tpu.pipeline_mode<synchronous>, transform_indices = @transform_2, window_bounds = array<i64: 1, 4, 1>}, {pipeline_mode = #tpu.pipeline_mode<synchronous>, transform_indices = @transform_3, window_bounds = array<i64: 2, 4, 256>}]} {
    %c0 = arith.constant 0 : index
    %c0_0 = arith.constant 0 : index
    %c0_1 = arith.constant 0 : index
    %0 = vector.load %arg1[%c0, %c0_0, %c0_1] : memref<2x4x256xf32, #tpu.memory_space<vmem>>, vector<2x4x256xf32>
    %cst = arith.constant dense<0.000000e+00> : vector<2x4xf32>
    %1 = vector.multi_reduction <add>, %0, %cst [2] : vector<2x4x256xf32> to vector<2x4xf32>
    %2 = vector.shape_cast %1 : vector<2x4xf32> to vector<2x4x1xf32>
    %3 = arith.mulf %0, %0 : vector<2x4x256xf32>
    %cst_2 = arith.constant dense<0.000000e+00> : vector<2x4xf32>
    %4 = vector.multi_reduction <add>, %3, %cst_2 [2] : vector<2x4x256xf32> to vector<2x4xf32>
    %5 = vector.shape_cast %4 : vector<2x4xf32> to vector<2x4x1xf32>
    %cst_3 = arith.constant dense<0.000000e+00> : vector<4x1xf32>
    %6 = vector.multi_reduction <add>, %2, %cst_3 [0] : vector<2x4x1xf32> to vector<4x1xf32>
    %7 = vector.shape_cast %6 : vector<4x1xf32> to vector<1x4x1xf32>
    %cst_4 = arith.constant 0.001953125 : f32
    %8 = vector.broadcast %cst_4 : f32 to vector<1x4x1xf32>
    %9 = arith.mulf %7, %8 : vector<1x4x1xf32>
    %cst_5 = arith.constant dense<0.000000e+00> : vector<4x1xf32>
    %10 = vector.multi_reduction <add>, %5, %cst_5 [0] : vector<2x4x1xf32> to vector<4x1xf32>
    %11 = vector.shape_cast %10 : vector<4x1xf32> to vector<1x4x1xf32>
    %cst_6 = arith.constant 0.001953125 : f32
    %12 = vector.broadcast %cst_6 : f32 to vector<1x4x1xf32>
    %13 = arith.mulf %11, %12 : vector<1x4x1xf32>
    %14 = arith.mulf %9, %9 : vector<1x4x1xf32>
    %15 = arith.subf %13, %14 : vector<1x4x1xf32>
    %cst_7 = arith.constant 0.000000e+00 : f32
    %16 = vector.broadcast %cst_7 : f32 to vector<1x4x1xf32>
    %17 = arith.maximumf %15, %16 : vector<1x4x1xf32>
    %cst_8 = arith.constant 9.99999974E-6 : f32
    %18 = vector.broadcast %cst_8 : f32 to vector<1x4x1xf32>
    %19 = arith.addf %17, %18 : vector<1x4x1xf32>
    %20 = math.rsqrt %19 : vector<1x4x1xf32>
    %c0_9 = arith.constant 0 : index
    %c0_10 = arith.constant 0 : index
    %c0_11 = arith.constant 0 : index
    %21 = vector.load %arg2[%c0_9, %c0_10, %c0_11] : memref<1x4x1xf32, #tpu.memory_space<vmem>>, vector<1x4x1xf32>
    %22 = arith.mulf %21, %20 : vector<1x4x1xf32>
    %c0_12 = arith.constant 0 : index
    %c0_13 = arith.constant 0 : index
    %c0_14 = arith.constant 0 : index
    %23 = vector.load %arg3[%c0_12, %c0_13, %c0_14] : memref<1x4x1xf32, #tpu.memory_space<vmem>>, vector<1x4x1xf32>
    %24 = arith.mulf %9, %22 : vector<1x4x1xf32>
    %25 = arith.subf %23, %24 : vector<1x4x1xf32>
    %26 = vector.broadcast %22 : vector<1x4x1xf32> to vector<2x4x256xf32>
    %27 = arith.mulf %0, %26 : vector<2x4x256xf32>
    %28 = vector.broadcast %25 : vector<1x4x1xf32> to vector<2x4x256xf32>
    %29 = arith.addf %27, %28 : vector<2x4x256xf32>
    %c0_15 = arith.constant 0 : index
    %c0_16 = arith.constant 0 : index
    %c0_17 = arith.constant 0 : index
    %30 = vector.load %arg4[%c0_15, %c0_16, %c0_17] : memref<2x4x256xf32, #tpu.memory_space<vmem>>, vector<2x4x256xf32>
    tpu.vector_store %arg4[%c0_15, %c0_16, %c0_17], %29 {strides = array<i32>} : memref<2x4x256xf32, #tpu.memory_space<vmem>>, vector<2x4x256xf32>,
    return
  }
  func.func @transform_0(%arg0: i32) -> (i32, i32, i32) {
    %c0_i32 = arith.constant 0 : i32
    %c0_i32_0 = arith.constant 0 : i32
    %c0_i32_1 = arith.constant 0 : i32
    %c0_i32_2 = arith.constant 0 : i32
    return %c0_i32, %c0_i32_0, %c0_i32_1 : i32, i32, i32
  }
  func.func @transform_1(%arg0: i32) -> (i32, i32, i32) {
    %c0_i32 = arith.constant 0 : i32
    %c0_i32_0 = arith.constant 0 : i32
    %c0_i32_1 = arith.constant 0 : i32
    %c0_i32_2 = arith.constant 0 : i32
    return %c0_i32, %c0_i32_0, %c0_i32_1 : i32, i32, i32
  }
  func.func @transform_2(%arg0: i32) -> (i32, i32, i32) {
    %c0_i32 = arith.constant 0 : i32
    %c0_i32_0 = arith.constant 0 : i32
    %c0_i32_1 = arith.constant 0 : i32
    %c0_i32_2 = arith.constant 0 : i32
    return %c0_i32, %c0_i32_0, %c0_i32_1 : i32, i32, i32
  }
  func.func @transform_3(%arg0: i32) -> (i32, i32, i32) {
    %c0_i32 = arith.constant 0 : i32
    %c0_i32_0 = arith.constant 0 : i32
    %c0_i32_1 = arith.constant 0 : i32
    %c0_i32_2 = arith.constant 0 : i32
    return %c0_i32, %c0_i32_0, %c0_i32_1 : i32, i32, i32
  }
}

</mosaic_0001>

<bundles_post_ra>
// kernel: tpu_custom_call.1
= control target key start
LH: loop header
LB: loop body
LE: loop exit
PB: predicated region body
PF: predicated region fallthrough
CT: control target
= control target key end

     0   :  { %8 = vsyncpa [#allocation3], 0  ;;  %s259_s0 = inlined_call_operand.hbm [shape: f32[2,4,256], index: 0, kind: input, shape index: {}]   ;;  %s260_s1 = inlined_call_operand.vmem [shape: f32[1,4,1], index: 1, kind: input, shape index: {}]   ;;  %s261_s2 = inlined_call_operand.vmem [shape: f32[1,4,1], index: 2, kind: input, shape index: {}]   ;;  %s262_s3 = inlined_call_operand.hbm [shape: f32[2,4,256], index: 3, kind: output, shape index: {}]  }
   0x1   :  { %9 = vsyncpa [#allocation4], 0  ;;  %s187_s12 = smov [#allocation2]  }
   0x2   :  { %s15_s13 = sshll.u32 %s187_s12, 4  ;;  %s16_s13 = int_to_ptr.vmem [resolvable:$true] %s15_s13 }
   0x3   :  { %s151_s14 = scalar_lea.vmem %s16_s13, 256  ;;  %p156_p1 = scmp.lt.s32.totalorder %s16_s13, %s16_s13 }
   0x4   :  { %p152_p0 = scmp.ne.s32.totalorder %s16_s13, %s151_s14  ;;  %p157_p2 = scmp.lt.s32.totalorder %s151_s14, %s151_s14 }
   0x6   :  { %p158_p3 = por %p157_p2, %p156_p1 }
   0x8   :  { %p159_p4 = pnand %p158_p3, %p152_p0 }
   0xa   :  { %162 = shalt.err (!%p159_p4)
}
   0xb   :  { %s188_s15 = smov 128   ;;  %s189_s16 = smov 8  }
   0xc   :  { %21 = dma.hbm_to_vmem [thread:$0]  %s259_s0, 256, %s16_s13, [#allocation3], %s188_s15, %s188_s15, %s189_s16  }
   0xd   :  { %183 = dma.done.wait [#allocation3], 256  }
   0xe   :  { %184 = vsyncadd [#allocation3], 4294967040  ;;  %vm37_vm0 = vcmask 1043456   ;;  %v219_v0 = vld [vmem:[#allocation2] sm:$0xff]  ;;  %v221_v1 = vld [vmem:[#allocation2 + $0x8] sm:$0xff]  ;;  %v190_v20 = vmov 0   ;;  %v91_v45 = vlaneseq }
   0xf   :  { %v33_v2 = vcombine.high %v219_v0, %v219_v0  ;;  %v38_v3 = vsel %vm37_vm0, %v219_v0, 0.0  ;;  %v48_v4 = vmul.f32 %v219_v0, %v219_v0  ;;  %v34_v5 = vcombine.high %v221_v1, %v221_v1  ;;  %137 = vset.pattern.permute.xlu0 %v190_v20  ;;  %138 = vset.pattern.permute.xlu1 %v190_v20  ;;  %v79_v37 = vld [vmem:[%s260_s1] sm:$0xf]  ;;  %s192_s1 = smov [#allocation5]  }
  0x10   :  { %v43_v6 = vsel %vm37_vm0, %v221_v1, 0.0  ;;  %v49_v7 = vmul.f32 %v221_v1, %v221_v1  ;;  %v81_v40 = vld [vmem:[%s261_s2] sm:$0xf]  ;;  %v191_v43 = vmov 839922192   ;;  %v92_v47 = vshrl.u32 %v91_v45, 7 }
  0x11   :  { %v39_v8 = vsel %vm37_vm0, %v33_v2, 0.0  ;;  %v52_v9 = vcombine.high %v48_v4, %v48_v4  ;;  %v56_v10 = vsel %vm37_vm0, %v48_v4, 0.0  ;;  %v44_v11 = vsel %vm37_vm0, %v34_v5, 0.0  ;;  %s119_s22 = sshll.u32 %s192_s1, 4  ;;  %s120_s22 = int_to_ptr.vmem [resolvable:$true] %s119_s22 }
  0x12   :  { %v40_v12 = vadd.f32 %v39_v8, %v38_v3  ;;  %v53_v13 = vcombine.high %v49_v7, %v49_v7  ;;  %v61_v15 = vsel %vm37_vm0, %v49_v7, 0.0  ;;  %v45_v17 = vadd.f32 %v44_v11, %v43_v6  ;;  %s163_s2 = scalar_lea.vmem %s120_s22, 256  ;;  %p168_p6 = scmp.lt.s32.totalorder %s120_s22, %s120_s22 }
  0x13   :  { %v57_v14 = vsel %vm37_vm0, %v52_v9, 0.0  ;;  %v89_v44 = vunpack.c.l.s4 %v191_v43  ;;  %p164_p5 = scmp.ne.s32.totalorder %s120_s22, %s163_s2  ;;  %p169_p7 = scmp.lt.s32.totalorder %s163_s2, %s163_s2 }
  0x14   :  { %41 = vadd.xlane.f32.xlu0 %v40_v12  ;;  %v58_v16 = vadd.f32 %v57_v14, %v56_v10  ;;  %v62_v18 = vsel %vm37_vm0, %v53_v13, 0.0 }
  0x15   :  { %v63_v19 = vadd.f32 %v62_v18, %v61_v15  ;;  %v90_v46 = vunpack.c.0.s8 %v89_v44  ;;  %p170_p8 = por %p169_p7, %p168_p6 }
  0x16   :  { %59 = vadd.xlane.f32.xlu1 %v58_v16 }
  0x17   :  { %v93_v48 = vsub.s32 %v90_v46, %v92_v47  ;;  %p171_p9 = pnand %p170_p8, %p164_p5 }
  0x18   :  { %46 = vadd.xlane.f32.xlu0 %v45_v17 }
  0x1a   :  { %64 = vadd.xlane.f32.xlu1 %v63_v19 }
  0x9d   :  { %v42_v21 = vpop.xlane.xlu0 %41 }
  0x9e   :  { %v66_v24 = vsel %vm37_vm0, %v42_v21, 0.0 }
  0x9f   :  { %v60_v22 = vpop.xlane.xlu1 %59 }
  0xa0   :  { %v70_v28 = vsel %vm37_vm0, %v60_v22, 0.0 }
  0xa1   :  { %v47_v23 = vpop.xlane.xlu0 %46 }
  0xa2   :  { %v67_v25 = vsel %vm37_vm0, %v47_v23, 0.0 }
  0xa3   :  { %v68_v26 = vadd.f32 %v67_v25, %v66_v24  ;;  %v65_v27 = vpop.xlane.xlu1 %64 }
  0xa4   :  { %v71_v29 = vsel %vm37_vm0, %v65_v27, 0.0 }
  0xa5   :  { %v69_v30 = vmul.f32 0.001953125, %v68_v26  ;;  %v72_v31 = vadd.f32 %v71_v29, %v70_v28 }
  0xa7   :  { %v74_v32 = vmul.f32 %v69_v30, %v69_v30  ;;  %v73_v33 = vmul.f32 0.001953125, %v72_v31 }
  0xa9   :  { %v75_v34 = vsub.f32 %v73_v33, %v74_v32 }
  0xab   :  { %v76_v35 = vmax.f32 %v75_v34, 0.0 }
  0xad   :  { %v77_v36 = vadd.f32 1e-05, %v76_v35 }
  0xaf   :  { %141 = vrsqrt.f32 %v77_v36 }
  0xbc   :  { %v142_v38 = vpop.eup %141 }
  0xbd   :  { %v80_v39 = vmul.f32 %v142_v38, %v79_v37 }
  0xbf   :  { %86 = vperm.xlu0 %137, %v80_v39   ;;  %v82_v41 = vmul.f32 %v80_v39, %v69_v30 }
  0xc1   :  { %v83_v42 = vsub.f32 %v81_v40, %v82_v41 }
  0xc3   :  { %100 = vperm.xlu1 %138, %v83_v42  }
 0x13a   :  { %v87_v49 = vpop.permute.xlu0 %86 }
 0x13b   :  { %v94_v50 = vrot.slane %v87_v49, %v93_v48 }
 0x13d   :  { %v96_v52 = vmul.f32 %v94_v50, %v219_v0  ;;  %v97_v53 = vmul.f32 %v94_v50, %v221_v1 }
 0x13e   :  { %v101_v51 = vpop.permute.xlu1 %100 }
 0x13f   :  { %v108_v54 = vrot.slane %v101_v51, %v93_v48 }
 0x141   :  { %v110_v55 = vadd.f32 %v108_v54, %v96_v52  ;;  %v111_v56 = vadd.f32 %v108_v54, %v97_v53 }
 0x143   :  { %112 = vst [vmem:[#allocation5] sm:$0xff] %v110_v55  ;;  %113 = vst [vmem:[#allocation5 + $0x8] sm:$0xff] %v111_v56 }
 0x144   :  { %174 = shalt.err (!%p171_p9)
}
 0x145   :  { %125 = dma.vmem_to_hbm [thread:$0]  %s120_s22, 256, %s262_s3, [#allocation4], %s188_s15, %s188_s15, %s189_s16  }
 0x146   :  { %185 = dma.done.wait [#allocation4], 256  }
 0x147   :  { %186 = vsyncadd [#allocation4], 4294967040 }
 0x148   :  { %129 = vsyncpa [#allocation3], 1 }
 0x149   :  { %130 = vsyncpa [#allocation4], 1 }

</bundles_post_ra>
